<compile_context>
chip_gen: v5e
topology: v5e:2x2
jax: 0.10.0
libtpu: 0.0.40
codegen_flags: <defaults>
</compile_context>

<pallas_src>
import functools

import numpy as np
import jax
import jax.numpy as jnp
from jax.experimental import pallas as pl
from jax.experimental.pallas import tpu as pltpu


# ----------------------------------------------------------------------------
# Parameter construction (mirrors torch.nn.init.orthogonal_ semantics)
# ----------------------------------------------------------------------------
def _orthogonal(rng, out_dim, in_dim, gain):
    rows, cols = out_dim, in_dim
    flat = rng.standard_normal((rows, cols)).astype(np.float32)
    if rows < cols:
        flat = flat.T
    q, r = np.linalg.qr(flat)
    d = np.sign(np.diag(r))
    d[d == 0] = 1.0
    q = q * d[None, :]
    if rows < cols:
        q = q.T
    w = (gain * q[:rows, :cols]).astype(np.float32)   # (out, in) like torch
    return w.T                                         # return (in, out)


def make_twin_q_params(state_dim, action_dim, hidden_dim, seed=0):
    rng = np.random.default_rng(seed)
    gain = float(np.sqrt(2.0))
    in_dim = state_dim + action_dim
    H = hidden_dim

    W1, W2, Wo = [], [], []
    for _ in range(2):  # two Q networks (n_hidden_layers=2 -> fc1, 1 hidden, fc_out)
        W1.append(_orthogonal(rng, H, in_dim, gain))   # (S+A, H)
        W2.append(_orthogonal(rng, H, H, gain))        # (H, H)
        Wo.append(_orthogonal(rng, 1, H, 0.01))        # (H, 1)

    # --- fused layouts consumed by the kernel ---
    W1_f = np.concatenate(W1, axis=1)                  # (S+A, 2H)  twin-stacked fc1
    W1s = W1_f[:state_dim]                             # (S, 2H) rows hit by `state`
    W1a = W1_f[state_dim:]                             # (A, 2H) rows hit by `action`
    Wo_bd = np.zeros((2 * H, 2), np.float32)           # fused width-2 fc_out
    Wo_bd[:H, 0] = Wo[0][:, 0]
    Wo_bd[H:, 1] = Wo[1][:, 0]

    params = dict(
        W1s=jnp.asarray(W1s),
        W1a=jnp.asarray(W1a),
        b1=jnp.zeros((1, 2 * H), jnp.float32),
        b2=jnp.zeros((1, 2 * H), jnp.float32),
        Wo=jnp.asarray(Wo_bd),
        bo=jnp.zeros((1, 2), jnp.float32),
        H=H,
        # per-twin params kept for the pure-JAX reference check
        W1_t=jnp.stack(W1), b1_t=jnp.zeros((2, 1, H), jnp.float32),
        W2_t=jnp.stack(W2), b2_t=jnp.zeros((2, 1, H), jnp.float32),
        Wo_t=jnp.stack(Wo), bo_t=jnp.zeros((2, 1, 1), jnp.float32),
    )
    if H % 128 == 0:
        # Lane-aligned hidden width: per-twin half-slab fc2 (no zero block).
        params["W2a"] = jnp.asarray(W2[0])             # (H, H)
        params["W2b"] = jnp.asarray(W2[1])             # (H, H)
    else:
        W2_bd = np.zeros((2 * H, 2 * H), np.float32)   # block-diagonal fc2
        W2_bd[:H, :H] = W2[0]
        W2_bd[H:, H:] = W2[1]
        params["W2"] = jnp.asarray(W2_bd)
    return params


# ----------------------------------------------------------------------------
# Pallas kernels: one grid step == one batch tile, BOTH twins fused.
# ----------------------------------------------------------------------------
def _twin_q_kernel_bd(s_ref, a_ref, w1s_ref, w1a_ref, b1_ref,
                      w2_ref, b2_ref, wo_ref, bo_ref, q_ref):
    # fc1 for both twins, no concat: split-row matmuls on state and action.
    h = jnp.dot(s_ref[...], w1s_ref[...], preferred_element_type=jnp.float32)
    h = h + jnp.dot(a_ref[...], w1a_ref[...], preferred_element_type=jnp.float32)
    h = jnp.maximum(h + b1_ref[...], 0.0)                                  # (TB, 2H)
    # hidden Linear + ReLU; block-diagonal W2 keeps twins independent (small H).
    h = jnp.dot(h, w2_ref[...], preferred_element_type=jnp.float32) + b2_ref[...]
    h = jnp.maximum(h, 0.0)                                                # (TB, 2H)
    # fused fc_out: one MXU dot with output width 2 (not two N=1 dots).
    q = jnp.dot(h, wo_ref[...], preferred_element_type=jnp.float32) + bo_ref[...]
    q_ref[...] = q.astype(q_ref.dtype)                                     # (TB, 2)


def _twin_q_kernel_split(s_ref, a_ref, w1s_ref, w1a_ref, b1_ref,
                         w2a_ref, w2b_ref, b2_ref, wo_ref, bo_ref, q_ref,
                         *, hidden):
    h = jnp.dot(s_ref[...], w1s_ref[...], preferred_element_type=jnp.float32)
    h = h + jnp.dot(a_ref[...], w1a_ref[...], preferred_element_type=jnp.float32)
    h = jnp.maximum(h + b1_ref[...], 0.0)                                  # (TB, 2H)
    # Per-twin half-slab fc2 (hidden % 128 == 0 -> lane-aligned slices/concat).
    h2a = jnp.dot(h[:, :hidden], w2a_ref[...], preferred_element_type=jnp.float32)
    h2b = jnp.dot(h[:, hidden:], w2b_ref[...], preferred_element_type=jnp.float32)
    h2 = jnp.concatenate([h2a, h2b], axis=-1) + b2_ref[...]
    h2 = jnp.maximum(h2, 0.0)                                              # (TB, 2H)
    q = jnp.dot(h2, wo_ref[...], preferred_element_type=jnp.float32) + bo_ref[...]
    q_ref[...] = q.astype(q_ref.dtype)                                     # (TB, 2)


def _round_up(x, m):
    return ((x + m - 1) // m) * m


def twin_q_forward(state, action, params, tile_b_cap=4096, min_tiles=1):
    """Returns (q1, q2), each of shape (B, 1) float32.

    tile_b_cap: max rows per batch tile (big tiles amortize the ~0.35us/step
                pipeline overhead; working set stays well under VMEM limits).
    min_tiles : set to 2 on v7x so the "parallel" batch axis shards across the
                two TensorCores when B is large enough to be worth it.
    """
    state = state.astype(jnp.float32)
    action = action.astype(jnp.float32)
    B, S = state.shape
    A = action.shape[1]
    H2 = params["W1s"].shape[1]  # 2 * hidden_dim
    H = H2 // 2
    split_fc2 = "W2a" in params

    # Tile-count-first tiling: minimal grid steps, padding handled by Pallas
    # edge-block masking (no wrapper-side jnp.pad of the inputs).
    n_tiles = max(int(min_tiles), pl.cdiv(B, int(tile_b_cap)))
    TILE_B = _round_up(pl.cdiv(B, n_tiles), 8)
    grid = (pl.cdiv(B, TILE_B),)

    rep = lambda i: (0, 0)        # weights/biases: same block every batch tile
    bmap = lambda i: (i, 0)       # batch-tiled arrays

    in_specs = [
        pl.BlockSpec((TILE_B, S), bmap),   # state tile
        pl.BlockSpec((TILE_B, A), bmap),   # action tile
        pl.BlockSpec((S, H2), rep),        # W1[:S]  (twin-stacked)
        pl.BlockSpec((A, H2), rep),        # W1[S:]
        pl.BlockSpec((1, H2), rep),        # b1 (both twins)
    ]
    if split_fc2:
        kernel = functools.partial(_twin_q_kernel_split, hidden=H)
        w2_args = (params["W2a"], params["W2b"])
        in_specs += [pl.BlockSpec((H, H), rep),    # W2 twin 0
                     pl.BlockSpec((H, H), rep)]    # W2 twin 1
        fc2_flops = 2 * B * 2 * H * H
        w2_elems = 2 * H * H
    else:
        kernel = _twin_q_kernel_bd
        w2_args = (params["W2"],)
        in_specs += [pl.BlockSpec((H2, H2), rep)]  # W2 block-diagonal
        fc2_flops = 2 * B * H2 * H2
        w2_elems = H2 * H2
    in_specs += [
        pl.BlockSpec((1, H2), rep),        # b2
        pl.BlockSpec((H2, 2), rep),        # Wo (fused width-2)
        pl.BlockSpec((1, 2), rep),         # bo
    ]

    flops = 2 * B * (S + A) * H2 + fc2_flops + 2 * B * H2 * 2
    bytes_accessed = 4 * (B * (S + A + 2)
                          + (S + A) * H2 + w2_elems + H2 * 2
                          + 2 * H2 + 2)

    grid_spec = pltpu.PrefetchScalarGridSpec(
        num_scalar_prefetch=0,
        grid=grid,
        in_specs=in_specs,
        out_specs=pl.BlockSpec((TILE_B, 2), bmap),
    )

    q_both = pl.pallas_call(
        kernel,
        out_shape=jax.ShapeDtypeStruct((B, 2), jnp.float32),
        grid_spec=grid_spec,
        compiler_params=pltpu.CompilerParams(
            dimension_semantics=("parallel",)),   # batch tiles independent
        cost_estimate=pl.CostEstimate(
            flops=int(flops), transcendentals=0,
            bytes_accessed=int(bytes_accessed)),
    )(state, action,
      params["W1s"], params["W1a"], params["b1"],
      *w2_args, params["b2"], params["Wo"], params["bo"])

    return q_both[:, 0:1], q_both[:, 1:2]


# ----------------------------------------------------------------------------
# Pure-JAX reference (per-twin, matches the PyTorch forward)
# ----------------------------------------------------------------------------
def twin_q_reference(state, action, params):
    hi = jax.lax.Precision.HIGHEST
    x = jnp.concatenate([state, action], axis=-1).astype(jnp.float32)
    outs = []
    for q in range(2):
        h = jnp.maximum(
            jnp.dot(x, params["W1_t"][q], precision=hi) + params["b1_t"][q], 0.0)
        h = jnp.maximum(
            jnp.dot(h, params["W2_t"][q], precision=hi) + params["b2_t"][q], 0.0)
        outs.append(jnp.dot(h, params["Wo_t"][q], precision=hi) + params["bo_t"][q])
    return outs[0], outs[1]


if __name__ == "__main__":
    key = jax.random.PRNGKey(0)
    k_s, k_a, k_s3, k_a3 = jax.random.split(key, 4)

    # Case 1: small shapes (block-diagonal fc2 path, H < 128), single tile.
    B, state_dim, action_dim, hidden_dim = 8, 16, 8, 32
    params = make_twin_q_params(state_dim, action_dim, hidden_dim, seed=0)
    state = jax.random.normal(k_s, (B, state_dim), dtype=jnp.float32)
    action = jax.random.normal(k_a, (B, action_dim), dtype=jnp.float32)

    q1, q2 = twin_q_forward(state, action, params)
    jax.block_until_ready((q1, q2))
    r1, r2 = twin_q_reference(state, action, params)
    assert q1.shape == (B, 1) and q2.shape == (B, 1)
    np.testing.assert_allclose(np.asarray(q1), np.asarray(r1), rtol=1e-4, atol=1e-5)
    np.testing.assert_allclose(np.asarray(q2), np.asarray(r2), rtol=1e-4, atol=1e-5)

    # Case 2: lane-aligned hidden width (H = 128) -> half-slab fc2 path.
    params2 = make_twin_q_params(state_dim, action_dim, 128, seed=1)
    q1b, q2b = twin_q_forward(state, action, params2)
    jax.block_until_ready((q1b, q2b))
    r1b, r2b = twin_q_reference(state, action, params2)
    np.testing.assert_allclose(np.asarray(q1b), np.asarray(r1b), rtol=1e-4, atol=1e-5)
    np.testing.assert_allclose(np.asarray(q2b), np.asarray(r2b), rtol=1e-4, atol=1e-5)

    # Case 3: multi-tile grid with a partial last block (no wrapper jnp.pad).
    B3 = 20
    state3 = jax.random.normal(k_s3, (B3, state_dim), dtype=jnp.float32)
    action3 = jax.random.normal(k_a3, (B3, action_dim), dtype=jnp.float32)
    q1c, q2c = twin_q_forward(state3, action3, params, tile_b_cap=8)
    jax.block_until_ready((q1c, q2c))
    r1c, r2c = twin_q_reference(state3, action3, params)
    np.testing.assert_allclose(np.asarray(q1c), np.asarray(r1c), rtol=1e-4, atol=1e-5)
    np.testing.assert_allclose(np.asarray(q2c), np.asarray(r2c), rtol=1e-4, atol=1e-5)

    print("KERNEL_OK")
</pallas_src>

<mosaic_0001>
module attributes {stable_mosaic.version = 11 : i64} {
  func.func @_twin_q_kernel_bd(%arg0: i32, %arg1: memref<8x16xf32, #tpu.memory_space<vmem>>, %arg2: memref<8x8xf32, #tpu.memory_space<vmem>>, %arg3: memref<16x64xf32, #tpu.memory_space<vmem>>, %arg4: memref<8x64xf32, #tpu.memory_space<vmem>>, %arg5: memref<1x64xf32, #tpu.memory_space<vmem>>, %arg6: memref<64x64xf32, #tpu.memory_space<vmem>>, %arg7: memref<1x64xf32, #tpu.memory_space<vmem>>, %arg8: memref<64x2xf32, #tpu.memory_space<vmem>>, %arg9: memref<1x2xf32, #tpu.memory_space<vmem>>, %arg10: memref<8x2xf32, #tpu.memory_space<vmem>>) attributes {dimension_semantics = [#tpu.dimension_semantics<parallel>], iteration_bounds = array<i64: 1>, scalar_prefetch = 0 : i64, scratch_operands = 0 : i64, tpu.core_type = #tpu.core_type<tc>, window_params = [{transform_indices = @transform_0, window_bounds = array<i64: 8, 16>}, {transform_indices = @transform_1, window_bounds = array<i64: 8, 8>}, {pipeline_mode = #tpu.pipeline_mode<synchronous>, transform_indices = @transform_2, window_bounds = array<i64: 16, 64>}, {pipeline_mode = #tpu.pipeline_mode<synchronous>, transform_indices = @transform_3, window_bounds = array<i64: 8, 64>}, {pipeline_mode = #tpu.pipeline_mode<synchronous>, transform_indices = @transform_4, window_bounds = array<i64: 1, 64>}, {pipeline_mode = #tpu.pipeline_mode<synchronous>, transform_indices = @transform_5, window_bounds = array<i64: 64, 64>}, {pipeline_mode = #tpu.pipeline_mode<synchronous>, transform_indices = @transform_6, window_bounds = array<i64: 1, 64>}, {pipeline_mode = #tpu.pipeline_mode<synchronous>, transform_indices = @transform_7, window_bounds = array<i64: 64, 2>}, {pipeline_mode = #tpu.pipeline_mode<synchronous>, transform_indices = @transform_8, window_bounds = array<i64: 1, 2>}, {transform_indices = @transform_9, window_bounds = array<i64: 8, 2>}]} {
    %c0 = arith.constant 0 : index
    %c0_0 = arith.constant 0 : index
    %0 = vector.load %arg1[%c0, %c0_0] : memref<8x16xf32, #tpu.memory_space<vmem>>, vector<8x16xf32>
    %c0_1 = arith.constant 0 : index
    %c0_2 = arith.constant 0 : index
    %1 = vector.load %arg3[%c0_1, %c0_2] : memref<16x64xf32, #tpu.memory_space<vmem>>, vector<16x64xf32>
    %cst = arith.constant dense<0.000000e+00> : vector<8x64xf32>
    %2 = tpu.matmul %0, %1, %cst {dimension_numbers = #tpu.dot_dimension_numbers<[1], [0], [0], [1], [0, 0, 1, 1], [], []>} : vector<8x16xf32>, vector<16x64xf32>, vector<8x64xf32> -> vector<8x64xf32>
    %c0_3 = arith.constant 0 : index
    %c0_4 = arith.constant 0 : index
    %3 = vector.load %arg2[%c0_3, %c0_4] : memref<8x8xf32, #tpu.memory_space<vmem>>, vector<8x8xf32>
    %c0_5 = arith.constant 0 : index
    %c0_6 = arith.constant 0 : index
    %4 = vector.load %arg4[%c0_5, %c0_6] : memref<8x64xf32, #tpu.memory_space<vmem>>, vector<8x64xf32>
    %cst_7 = arith.constant dense<0.000000e+00> : vector<8x64xf32>
    %5 = tpu.matmul %3, %4, %cst_7 {dimension_numbers = #tpu.dot_dimension_numbers<[1], [0], [0], [1], [0, 0, 1, 1], [], []>} : vector<8x8xf32>, vector<8x64xf32>, vector<8x64xf32> -> vector<8x64xf32>
    %6 = arith.addf %2, %5 : vector<8x64xf32>
    %c0_8 = arith.constant 0 : index
    %c0_9 = arith.constant 0 : index
    %7 = vector.load %arg5[%c0_8, %c0_9] : memref<1x64xf32, #tpu.memory_space<vmem>>, vector<1x64xf32>
    %8 = vector.broadcast %7 : vector<1x64xf32> to vector<8x64xf32>
    %9 = arith.addf %6, %8 : vector<8x64xf32>
    %cst_10 = arith.constant 0.000000e+00 : f32
    %10 = vector.broadcast %cst_10 : f32 to vector<8x64xf32>
    %11 = arith.maximumf %9, %10 : vector<8x64xf32>
    %c0_11 = arith.constant 0 : index
    %c0_12 = arith.constant 0 : index
    %12 = vector.load %arg6[%c0_11, %c0_12] : memref<64x64xf32, #tpu.memory_space<vmem>>, vector<64x64xf32>
    %cst_13 = arith.constant dense<0.000000e+00> : vector<8x64xf32>
    %13 = tpu.matmul %11, %12, %cst_13 {dimension_numbers = #tpu.dot_dimension_numbers<[1], [0], [0], [1], [0, 0, 1, 1], [], []>} : vector<8x64xf32>, vector<64x64xf32>, vector<8x64xf32> -> vector<8x64xf32>
    %c0_14 = arith.constant 0 : index
    %c0_15 = arith.constant 0 : index
    %14 = vector.load %arg7[%c0_14, %c0_15] : memref<1x64xf32, #tpu.memory_space<vmem>>, vector<1x64xf32>
    %15 = vector.broadcast %14 : vector<1x64xf32> to vector<8x64xf32>
    %16 = arith.addf %13, %15 : vector<8x64xf32>
    %cst_16 = arith.constant 0.000000e+00 : f32
    %17 = vector.broadcast %cst_16 : f32 to vector<8x64xf32>
    %18 = arith.maximumf %16, %17 : vector<8x64xf32>
    %c0_17 = arith.constant 0 : index
    %c0_18 = arith.constant 0 : index
    %19 = vector.load %arg8[%c0_17, %c0_18] : memref<64x2xf32, #tpu.memory_space<vmem>>, vector<64x2xf32>
    %cst_19 = arith.constant dense<0.000000e+00> : vector<8x2xf32>
    %20 = tpu.matmul %18, %19, %cst_19 {dimension_numbers = #tpu.dot_dimension_numbers<[1], [0], [0], [1], [0, 0, 1, 1], [], []>} : vector<8x64xf32>, vector<64x2xf32>, vector<8x2xf32> -> vector<8x2xf32>
    %c0_20 = arith.constant 0 : index
    %c0_21 = arith.constant 0 : index
    %21 = vector.load %arg9[%c0_20, %c0_21] : memref<1x2xf32, #tpu.memory_space<vmem>>, vector<1x2xf32>
    %22 = vector.broadcast %21 : vector<1x2xf32> to vector<8x2xf32>
    %23 = arith.addf %20, %22 : vector<8x2xf32>
    %c0_22 = arith.constant 0 : index
    %c0_23 = arith.constant 0 : index
    %24 = vector.load %arg10[%c0_22, %c0_23] : memref<8x2xf32, #tpu.memory_space<vmem>>, vector<8x2xf32>
    tpu.vector_store %arg10[%c0_22, %c0_23], %23 {strides = array<i32>} : memref<8x2xf32, #tpu.memory_space<vmem>>, vector<8x2xf32>,
    return
  }
  func.func @transform_0(%arg0: i32) -> (i32, i32) {
    %c0_i32 = arith.constant 0 : i32
    %c0_i32_0 = arith.constant 0 : i32
    return %arg0, %c0_i32 : i32, i32
  }
  func.func @transform_1(%arg0: i32) -> (i32, i32) {
    %c0_i32 = arith.constant 0 : i32
    %c0_i32_0 = arith.constant 0 : i32
    return %arg0, %c0_i32 : i32, i32
  }
  func.func @transform_2(%arg0: i32) -> (i32, i32) {
    %c0_i32 = arith.constant 0 : i32
    %c0_i32_0 = arith.constant 0 : i32
    %c0_i32_1 = arith.constant 0 : i32
    return %c0_i32, %c0_i32_0 : i32, i32
  }
  func.func @transform_3(%arg0: i32) -> (i32, i32) {
    %c0_i32 = arith.constant 0 : i32
    %c0_i32_0 = arith.constant 0 : i32
    %c0_i32_1 = arith.constant 0 : i32
    return %c0_i32, %c0_i32_0 : i32, i32
  }
  func.func @transform_4(%arg0: i32) -> (i32, i32) {
    %c0_i32 = arith.constant 0 : i32
    %c0_i32_0 = arith.constant 0 : i32
    %c0_i32_1 = arith.constant 0 : i32
    return %c0_i32, %c0_i32_0 : i32, i32
  }
  func.func @transform_5(%arg0: i32) -> (i32, i32) {
    %c0_i32 = arith.constant 0 : i32
    %c0_i32_0 = arith.constant 0 : i32
    %c0_i32_1 = arith.constant 0 : i32
    return %c0_i32, %c0_i32_0 : i32, i32
  }
  func.func @transform_6(%arg0: i32) -> (i32, i32) {
    %c0_i32 = arith.constant 0 : i32
    %c0_i32_0 = arith.constant 0 : i32
    %c0_i32_1 = arith.constant 0 : i32
    return %c0_i32, %c0_i32_0 : i32, i32
  }
  func.func @transform_7(%arg0: i32) -> (i32, i32) {
    %c0_i32 = arith.constant 0 : i32
    %c0_i32_0 = arith.constant 0 : i32
    %c0_i32_1 = arith.constant 0 : i32
    return %c0_i32, %c0_i32_0 : i32, i32
  }
  func.func @transform_8(%arg0: i32) -> (i32, i32) {
    %c0_i32 = arith.constant 0 : i32
    %c0_i32_0 = arith.constant 0 : i32
    %c0_i32_1 = arith.constant 0 : i32
    return %c0_i32, %c0_i32_0 : i32, i32
  }
  func.func @transform_9(%arg0: i32) -> (i32, i32) {
    %c0_i32 = arith.constant 0 : i32
    %c0_i32_0 = arith.constant 0 : i32
    return %arg0, %c0_i32 : i32, i32
  }
}

</mosaic_0001>

<bundles_post_ra>
// kernel: tpu_custom_call.1
= control target key start
LH: loop header
LB: loop body
LE: loop exit
PB: predicated region body
PF: predicated region fallthrough
CT: control target
= control target key end

     0   :  { %14 = vsyncpa [#allocation3], 0  ;;  %s472_s0 = inlined_call_operand.hbm [shape: f32[8,16], index: 0, kind: input, shape index: {}]   ;;  %s473_s1 = inlined_call_operand.hbm [shape: f32[8,8], index: 1, kind: input, shape index: {}]   ;;  %s474_s2 = inlined_call_operand.hbm [shape: f32[16,64], index: 2, kind: input, shape index: {}]   ;;  %s475_s3 = inlined_call_operand.hbm [shape: f32[8,64], index: 3, kind: input, shape index: {}]   ;;  %s476_s4 = inlined_call_operand.vmem [shape: f32[1,64], index: 4, kind: input, shape index: {}]   ;;  %s477_s5 = inlined_call_operand.vmem [shape: f32[64,64], index: 5, kind: input, shape index: {}]   ;;  %s478_s6 = inlined_call_operand.vmem [shape: f32[1,64], index: 6, kind: input, shape index: {}]   ;;  %s479_s7 = inlined_call_operand.vmem [shape: f32[64,2], index: 7, kind: input, shape index: {}]   ;;  %s480_s8 = inlined_call_operand.vmem [shape: f32[1,2], index: 8, kind: input, shape index: {}]   ;;  %s481_s9 = inlined_call_operand.vmem [shape: f32[8,2], index: 9, kind: output, shape index: {}]  }
   0x1   :  { %15 = vsyncpa [#allocation5], 0  ;;  %s33_s11 = sshll.u32 %s473_s1, 4  ;;  %s34_s11 = int_to_ptr.hbm [resolvable:$true] %s33_s11 }
   0x2   :  { %16 = vsyncpa [#allocation8], 0  ;;  %s344_s12 = smov [#allocation4]   ;;  %s22_s16 = sshll.u32 %s472_s0, 4  ;;  %s23_s16 = int_to_ptr.hbm [resolvable:$true] %s22_s16 }
   0x3   :  { %s35_s13 = sshll.u32 %s344_s12, 4  ;;  %s345_s17 = smov [#allocation2]   ;;  %s36_s13 = int_to_ptr.vmem [resolvable:$true] %s35_s13 }
   0x4   :  { %38 = dma.hbm_to_vmem [thread:$0]  %s34_s11, 128, %s36_s13, [#allocation5]  }
   0x5   :  { %s24_s18 = sshll.u32 %s345_s17, 4  ;;  %s43_s21 = sshll.u32 %s474_s2, 4  ;;  %s25_s18 = int_to_ptr.vmem [resolvable:$true] %s24_s18  ;;  %s44_s21 = int_to_ptr.hbm [resolvable:$true] %s43_s21 }
   0x6   :  { %27 = dma.hbm_to_vmem [thread:$0]  %s23_s16, 128, %s25_s18, [#allocation3]  }
   0x7   :  { %s346_s1 = smov [#allocation6]   ;;  %s57_s25 = sshll.u32 %s475_s3, 4  ;;  %s58_s25 = int_to_ptr.hbm [resolvable:$true] %s57_s25 }
   0x8   :  { %s45_s22 = sshll.u32 %s346_s1, 4  ;;  %s347_s26 = smov 128   ;;  %s46_s22 = int_to_ptr.vmem [resolvable:$true] %s45_s22 }
   0x9   :  { %s348_s0 = smov 8   ;;  %s349_s27 = smov [#allocation7]  }
   0xa   :  { %51 = dma.hbm_to_vmem [thread:$0]  %s44_s21, 256, %s46_s22, [#allocation5], %s347_s26, %s347_s26, %s348_s0  }
   0xb   :  { %s59_s28 = sshll.u32 %s349_s27, 4  ;;  %s60_s28 = int_to_ptr.vmem [resolvable:$true] %s59_s28 }
   0xc   :  { %62 = dma.hbm_to_vmem [thread:$0]  %s58_s25, 128, %s60_s28, [#allocation8]  }
   0xd   :  { %338 = dma.done.wait [#allocation3], 128  }
   0xe   :  { %339 = vsyncadd [#allocation3], 4294967168 }
   0xf   :  { %340 = dma.done.wait [#allocation5], 384  }
  0x10   :  { %341 = vsyncadd [#allocation5], 4294966912 }
  0x11   :  { %342 = dma.done.wait [#allocation8], 128  }
  0x12   :  { %343 = vsyncadd [#allocation8], 4294967168  ;;  %vm94_vm0 = vcmask 64512   ;;  %v91_v0 = vld [vmem:[#allocation6 + $0x8] sm:$0xff]  ;;  %v93_v1 = vld [vmem:[#allocation7] sm:$0xff]  ;;  %vm118_vm1 = vcmask 130048  }
  0x13   :  { %v90_v2 = vld [vmem:[#allocation6] sm:$0xff]  ;;  %136 = vmatpush.msra.mxu1 %v91_v0  ;;  %113 = vmatpush.msra.mxu0 %v93_v1  ;;  %v92_v3 = vld [vmem:[#allocation4] sm:$0xff]  ;;  %v89_v4 = vld [vmem:[#allocation2] sm:$0xff]  ;;  %vm160_vm2 = vcmask 523264   ;;  %vm220_vm3 = vcmask 15360  }
  0x14   :  { %v155_v5 = vld [vmem:[%s477_s5 + $0x38] sm:$0xff]  ;;  %229 = vmatmul.msk.f32.vlgmr.msra.gmra.mxu0 %vm94_vm0, %v92_v3  ;;  %v154_v6 = vld [vmem:[%s477_s5 + $0x30] sm:$0xff]  ;;  %v153_v7 = vld [vmem:[%s477_s5 + $0x28] sm:$0xff] }
  0x15   :  { %172 = vmatpush.msra.mxu2 %v155_v5  ;;  %137 = vmatpush.msra.mxu1 %v90_v2  ;;  %v152_v8 = vld [vmem:[%s477_s5 + $0x20] sm:$0xff]  ;;  %v151_v9 = vld [vmem:[%s477_s5 + $0x18] sm:$0xff]  ;;  %v150_v10 = vld [vmem:[%s477_s5 + $0x10] sm:$0xff] }
  0x16   :  { %230 = vmatmul.msk.f32.vlgmr.msra.gmra.mxu1 %vm118_vm1, %v89_v4  ;;  %v149_v11 = vld [vmem:[%s477_s5 + $0x8] sm:$0xff]  ;;  %v148_v12 = vld [vmem:[%s477_s5] sm:$0xff]  ;;  %v192_v13 = vld [vmem:[%s479_s7 + $0x38] sm:$0xff] }
  0x17   :  { %173 = vmatpush.msra.mxu2 %v154_v6  ;;  %v191_v14 = vld [vmem:[%s479_s7 + $0x30] sm:$0xff]  ;;  %208 = vmatpush.msra.mxu3 %v192_v13  ;;  %v190_v15 = vld [vmem:[%s479_s7 + $0x28] sm:$0xff]  ;;  %v189_v16 = vld [vmem:[%s479_s7 + $0x20] sm:$0xff] }
  0x18   :  { %v188_v17 = vld [vmem:[%s479_s7 + $0x18] sm:$0xff]  ;;  %v239_v19 = vld [vmem:[%s476_s4] ss:$0 sm:$0xff]  ;;  %v187_v24 = vld [vmem:[%s479_s7 + $0x10] sm:$0xff] }
  0x19   :  { %174 = vmatpush.msra.mxu2 %v153_v7  ;;  %209 = vmatpush.msra.mxu3 %v191_v14  ;;  %v186_v25 = vld [vmem:[%s479_s7 + $0x8] sm:$0xff]  ;;  %v185_v26 = vld [vmem:[%s479_s7] sm:$0xff] }
  0x1a   :  { %v240_v27 = vld [vmem:[%s478_s6] ss:$0 sm:$0xff] }
  0x1b   :  { %175 = vmatpush.msra.mxu2 %v152_v8  ;;  %210 = vmatpush.msra.mxu3 %v190_v15  ;;  %v241_v31 = vld [vmem:[%s480_s8] ss:$0 sm:$0xff] }
  0x1d   :  { %176 = vmatpush.msra.mxu2 %v151_v9  ;;  %211 = vmatpush.msra.mxu3 %v189_v16 }
  0x1f   :  { %177 = vmatpush.msra.mxu2 %v150_v10  ;;  %212 = vmatpush.msra.mxu3 %v188_v17 }
  0x21   :  { %178 = vmatpush.msra.mxu2 %v149_v11  ;;  %213 = vmatpush.msra.mxu3 %v187_v24 }
  0x23   :  { %179 = vmatpush.msra.mxu2 %v148_v12  ;;  %214 = vmatpush.msra.mxu3 %v186_v25 }
  0x25   :  { %215 = vmatpush.msra.mxu3 %v185_v26 }
  0x91   :  { %v115_v18 = vpop.f32.mrf.mxu0 }
  0x93   :  { %v139_v20 = vpop.f32.mrf.mxu1 }
  0x94   :  { %v140_v21 = vadd.f32 %v139_v20, %v115_v18 }
  0x96   :  { %v146_v22 = vadd.f32 %v239_v19, %v140_v21 }
  0x98   :  { %v147_v23 = vmax.f32 %v146_v22, 0.0 }
  0x9a   :  { %231 = vmatmul.msk.f32.vlgmr.msra.gmra.mxu2 %vm160_vm2, %v147_v23 }
 0x11d   :  { %v181_v28 = vpop.f32.mrf.mxu2 }
 0x11e   :  { %v182_v29 = vadd.f32 %v240_v27, %v181_v28 }
 0x120   :  { %v184_v30 = vmax.f32 %v182_v29, 0.0 }
 0x122   :  { %232 = vmatmul.msk.f32.vlgmr.msra.gmra.mxu3 %vm160_vm2, %v184_v30 }
 0x1a5   :  { %v217_v32 = vpop.f32.mrf.mxu3 }
 0x1a6   :  { %v218_v33 = vadd.f32 %v241_v31, %v217_v32 }
 0x1a8   :  { %221 = vst.msk [vmem:[%s481_s9] sm:$0xff] %vm220_vm3, %v218_v33 }
 0x1a9   :  { %226 = vsyncpa [#allocation3], 1 }
 0x1aa   :  { %227 = vsyncpa [#allocation5], 1 }
 0x1ab   :  { %228 = vsyncpa [#allocation8], 1 }

</bundles_post_ra>
